<compile_context>
chip_gen: v6e
topology: v6e:2x2x1
jax: 0.10.0
libtpu: 0.0.40
codegen_flags: <defaults>
</compile_context>

<pallas_src>
import functools

import jax
import jax.numpy as jnp
from jax.experimental import pallas as pl
from jax.experimental.pallas import tpu as pltpu


def _round_up(x, m):
    return (x + m - 1) // m * m


def _padded_f32_bytes(*shape):
    """f32 VMEM footprint after Mosaic (8, 128) tiling/padding (upper bound)."""
    s = list(shape)
    s[-1] = _round_up(s[-1], 128)
    if len(s) >= 2:
        s[-2] = _round_up(s[-2], 8)
    n = 1
    for d in s:
        n *= d
    return 4 * n


def _vmem_per_tile_bytes(tp, S, C, D):
    """Padded, double-buffered per-grid-step VMEM estimate."""
    blocks = (_padded_f32_bytes(tp, C)          # center_xyz tile
              + _padded_f32_bytes(tp, D)        # center_feature tile
              + _padded_f32_bytes(tp, S, C)     # grouped_xyz tile (heavily padded)
              + _padded_f32_bytes(tp, S, D)     # grouped_feature tile
              + _padded_f32_bytes(tp, D)        # output tile
              + _padded_f32_bytes(C, D)         # a[:C]
              + _padded_f32_bytes(D, D))        # a[C:]
    # f32 temporaries the compiler keeps live (gproj / e / p + small (TP,D)s).
    temps = 4 * _padded_f32_bytes(tp, S, D) + 4 * _padded_f32_bytes(tp, D)
    return 2 * blocks + temps


def _graph_attention_kernel(cx_ref, cf_ref, gx_ref, gf_ref, ap_ref, ah_ref,
                            out_ref, *, alpha, exp_dtype):
    """One tile of TP fused (B*npoint) rows per grid step.

    cx_ref : (TP, C)      center xyz
    cf_ref : (TP, D)      center feature
    gx_ref : (TP, S, C)   grouped xyz
    gf_ref : (TP, S, D)   grouped feature
    ap_ref : (C, D)       a[:C]   (xyz part of the attention weight)
    ah_ref : (D, D)       a[C:]   (feature part of the attention weight)
    out_ref: (TP, D)
    """
    tp, S, C = gx_ref.shape
    D = gf_ref.shape[-1]

    cx = cx_ref[...]
    cf = cf_ref[...]
    gx = gx_ref[...]
    gf = gf_ref[...]
    ap = ap_ref[...]
    ah = ah_ref[...]

    # (center - grouped) @ a  ==  center @ a - grouped @ a  (distributivity).
    # Both the K=D feature part and the K=C xyz part go to the MXU.
    cproj = (jnp.dot(cf, ah, preferred_element_type=jnp.float32)
             + jnp.dot(cx, ap, preferred_element_type=jnp.float32))       # (TP, D)
    gproj = (jnp.dot(gf.reshape(tp * S, D), ah,
                     preferred_element_type=jnp.float32)
             + jnp.dot(gx.reshape(tp * S, C), ap,
                       preferred_element_type=jnp.float32)
             ).reshape(tp, S, D)                                          # (TP, S, D)

    e = cproj[:, None, :] - gproj                                         # (TP, S, D)
    e = jnp.where(e > 0, e, alpha * e)                                    # LeakyReLU

    # Numerically-stable softmax over the nsample axis (dim=2 of the 4-D view).
    e_max = jnp.max(e, axis=1, keepdims=True)
    p = jnp.exp((e - e_max).astype(exp_dtype)).astype(jnp.float32)

    # Normalize AFTER pooling: the denominator does not depend on the sample
    # index, so sum_s(softmax * gf) == (sum_s exp * gf) * (1 / denom) exactly.
    denom = jnp.sum(p, axis=1)                                            # (TP, D)
    pooled = jnp.sum(p * gf.astype(jnp.float32), axis=1)                  # (TP, D)

    # TODO(synk): F.dropout(attention, dropout, training=True) has no in-kernel
    # equivalent here; inference mode (identity dropout) is implemented.
    out_ref[...] = (pooled * pl.reciprocal(denom, approx=True)).astype(out_ref.dtype)


def graph_attention(center_xyz, center_feature, grouped_xyz, grouped_feature,
                    a, *, alpha, point_tile=1024, softmax_in_bf16=None):
    B, npoint, C = center_xyz.shape
    _, _, nsample, D = grouped_feature.shape
    assert a.shape == (C + D, D)
    assert grouped_xyz.shape == (B, npoint, nsample, C)
    assert center_feature.shape == (B, npoint, D)

    if softmax_in_bf16 is None:
        # Only take the faster bf16 EUP/VPU exp path when the caller already
        # works in bf16 (accuracy is then already bf16-bounded).  v5e has no
        # bf16 VPU/EUP anyway, and the f32 default keeps outputs close to the
        # PyTorch module.
        softmax_in_bf16 = grouped_feature.dtype == jnp.bfloat16
    exp_dtype = jnp.bfloat16 if softmax_in_bf16 else jnp.float32

    a_p = a[:C, :]   # (C, D)
    a_h = a[C:, :]   # (D, D)

    # Every (b, point) row is independent -> fuse B and npoint into one axis.
    N = B * npoint
    cx2 = center_xyz.reshape(N, C)
    cf2 = center_feature.reshape(N, D)
    gx3 = grouped_xyz.reshape(N, nsample, C)
    gf3 = grouped_feature.reshape(N, nsample, D)

    # ---- Generation-aware tiling from Mosaic-padded VMEM footprints --------
    try:
        vmem_cap = int(pltpu.get_tpu_info().vmem_capacity_bytes)
    except Exception:  # interpret mode / old jax: assume v7x-sized VMEM.
        vmem_cap = 64 * 1024 * 1024
    vmem_cap = max(vmem_cap, 64 * 1024 * 1024)
    budget = int(0.55 * vmem_cap)            # headroom for compiler scratch

    per8 = _vmem_per_tile_bytes(8, nsample, C, D)
    tp = max(8, (budget // per8) * 8)                  # largest tile that fits
    tp = min(tp, max(8, (point_tile // 8) * 8))        # user cap
    if N > 8:
        # Keep grid >= 2: feeds both TensorCores on v7x and gives the DMA
        # pipeline something to overlap; nearly free on single-core chips.
        tp = min(tp, _round_up(pl.cdiv(N, 2), 8))
    tp = max(8, min(tp, _round_up(N, 8)))
    grid = (pl.cdiv(N, tp),)

    est = _vmem_per_tile_bytes(tp, nsample, C, D)
    vmem_limit = int(min(max(int(1.35 * est), 32 * 1024 * 1024),
                         int(0.75 * vmem_cap)))

    kernel = functools.partial(_graph_attention_kernel, alpha=alpha,
                               exp_dtype=exp_dtype)

    out2 = pl.pallas_call(
        kernel,
        out_shape=jax.ShapeDtypeStruct((N, D), center_feature.dtype),
        grid_spec=pltpu.PrefetchScalarGridSpec(
            num_scalar_prefetch=0,
            grid=grid,
            in_specs=[
                pl.BlockSpec((tp, C), lambda i: (i, 0)),
                pl.BlockSpec((tp, D), lambda i: (i, 0)),
                pl.BlockSpec((tp, nsample, C), lambda i: (i, 0, 0)),
                pl.BlockSpec((tp, nsample, D), lambda i: (i, 0, 0)),
                pl.BlockSpec((C, D), lambda i: (0, 0)),
                pl.BlockSpec((D, D), lambda i: (0, 0)),
            ],
            out_specs=pl.BlockSpec((tp, D), lambda i: (i, 0)),
        ),
        compiler_params=pltpu.CompilerParams(
            dimension_semantics=("parallel",),
            vmem_limit_bytes=vmem_limit),
    )(cx2, cf2, gx3, gf3, a_p, a_h)

    return out2.reshape(B, npoint, D)


def _reference(center_xyz, center_feature, grouped_xyz, grouped_feature, a,
               *, alpha):
    """Pure-JAX reference mirroring the PyTorch forward (eval mode)."""
    delta_p = center_xyz[:, :, None, :] - grouped_xyz
    delta_h = center_feature[:, :, None, :] - grouped_feature
    cat = jnp.concatenate([delta_p, delta_h], axis=-1)
    e = jnp.matmul(cat, a)
    e = jnp.where(e > 0, e, alpha * e)
    attn = jax.nn.softmax(e, axis=2)
    return jnp.sum(attn * grouped_feature, axis=2)


if __name__ == "__main__":
    # Small shapes consistent with the module: point-cloud style inputs.
    B, npoint, nsample, C, D = 2, 16, 8, 3, 32
    alpha = 0.2          # LeakyReLU negative slope
    all_channel = C + D  # == a.shape[0]
    feature_dim = D      # == a.shape[1]

    key = jax.random.PRNGKey(0)
    k1, k2, k3, k4, k5 = jax.random.split(key, 5)

    center_xyz = jax.random.normal(k1, (B, npoint, C), jnp.float32)
    center_feature = jax.random.normal(k2, (B, npoint, D), jnp.float32)
    grouped_xyz = jax.random.normal(k3, (B, npoint, nsample, C), jnp.float32)
    grouped_feature = jax.random.normal(k4, (B, npoint, nsample, D),
                                        jnp.float32)

    # Deterministic xavier_uniform_(gain=1.414) init for `a`.
    gain = 1.414
    bound = gain * (6.0 / (all_channel + feature_dim)) ** 0.5
    a = jax.random.uniform(k5, (all_channel, feature_dim), jnp.float32,
                           minval=-bound, maxval=bound)

    out = graph_attention(center_xyz, center_feature, grouped_xyz,
                          grouped_feature, a, alpha=alpha)
    out = jax.block_until_ready(out)

    ref = _reference(center_xyz, center_feature, grouped_xyz, grouped_feature,
                     a, alpha=alpha)
    assert out.shape == (B, npoint, D)
    # Tolerance loosened vs. 1e-5: approximate EUP reciprocal in the softmax
    # and the (exact-in-algebra) distributivity rewrite change fp rounding.
    assert jnp.allclose(out, ref, atol=5e-3, rtol=5e-3), (
        float(jnp.max(jnp.abs(out - ref))))

    print("KERNEL_OK")
</pallas_src>

<mosaic_0001>
module attributes {stable_mosaic.version = 11 : i64} {
  func.func @_graph_attention_kernel(%arg0: i32, %arg1: memref<16x3xf32, #tpu.memory_space<vmem>>, %arg2: memref<16x32xf32, #tpu.memory_space<vmem>>, %arg3: memref<16x8x3xf32, #tpu.memory_space<vmem>>, %arg4: memref<16x8x32xf32, #tpu.memory_space<vmem>>, %arg5: memref<3x32xf32, #tpu.memory_space<vmem>>, %arg6: memref<32x32xf32, #tpu.memory_space<vmem>>, %arg7: memref<16x32xf32, #tpu.memory_space<vmem>>) attributes {dimension_semantics = [#tpu.dimension_semantics<parallel>], iteration_bounds = array<i64: 2>, scalar_prefetch = 0 : i64, scratch_operands = 0 : i64, tpu.core_type = #tpu.core_type<tc>, window_params = [{transform_indices = @transform_0, window_bounds = array<i64: 16, 3>}, {transform_indices = @transform_1, window_bounds = array<i64: 16, 32>}, {transform_indices = @transform_2, window_bounds = array<i64: 16, 8, 3>}, {transform_indices = @transform_3, window_bounds = array<i64: 16, 8, 32>}, {pipeline_mode = #tpu.pipeline_mode<synchronous>, transform_indices = @transform_4, window_bounds = array<i64: 3, 32>}, {pipeline_mode = #tpu.pipeline_mode<synchronous>, transform_indices = @transform_5, window_bounds = array<i64: 32, 32>}, {transform_indices = @transform_6, window_bounds = array<i64: 16, 32>}]} {
    %c0 = arith.constant 0 : index
    %c0_0 = arith.constant 0 : index
    %0 = vector.load %arg1[%c0, %c0_0] : memref<16x3xf32, #tpu.memory_space<vmem>>, vector<16x3xf32>
    %c0_1 = arith.constant 0 : index
    %c0_2 = arith.constant 0 : index
    %1 = vector.load %arg2[%c0_1, %c0_2] : memref<16x32xf32, #tpu.memory_space<vmem>>, vector<16x32xf32>
    %c0_3 = arith.constant 0 : index
    %c0_4 = arith.constant 0 : index
    %c0_5 = arith.constant 0 : index
    %2 = vector.load %arg3[%c0_3, %c0_4, %c0_5] : memref<16x8x3xf32, #tpu.memory_space<vmem>>, vector<16x8x3xf32>
    %c0_6 = arith.constant 0 : index
    %c0_7 = arith.constant 0 : index
    %c0_8 = arith.constant 0 : index
    %3 = vector.load %arg4[%c0_6, %c0_7, %c0_8] : memref<16x8x32xf32, #tpu.memory_space<vmem>>, vector<16x8x32xf32>
    %c0_9 = arith.constant 0 : index
    %c0_10 = arith.constant 0 : index
    %4 = vector.load %arg5[%c0_9, %c0_10] : memref<3x32xf32, #tpu.memory_space<vmem>>, vector<3x32xf32>
    %c0_11 = arith.constant 0 : index
    %c0_12 = arith.constant 0 : index
    %5 = vector.load %arg6[%c0_11, %c0_12] : memref<32x32xf32, #tpu.memory_space<vmem>>, vector<32x32xf32>
    %cst = arith.constant dense<0.000000e+00> : vector<16x32xf32>
    %6 = tpu.matmul %1, %5, %cst {dimension_numbers = #tpu.dot_dimension_numbers<[1], [0], [0], [1], [0, 0, 1, 1], [], []>} : vector<16x32xf32>, vector<32x32xf32>, vector<16x32xf32> -> vector<16x32xf32>
    %cst_13 = arith.constant dense<0.000000e+00> : vector<16x32xf32>
    %7 = tpu.matmul %0, %4, %cst_13 {dimension_numbers = #tpu.dot_dimension_numbers<[1], [0], [0], [1], [0, 0, 1, 1], [], []>} : vector<16x3xf32>, vector<3x32xf32>, vector<16x32xf32> -> vector<16x32xf32>
    %8 = arith.addf %6, %7 : vector<16x32xf32>
    %9 = vector.shape_cast %3 : vector<16x8x32xf32> to vector<128x32xf32>
    %cst_14 = arith.constant dense<0.000000e+00> : vector<128x32xf32>
    %10 = tpu.matmul %9, %5, %cst_14 {dimension_numbers = #tpu.dot_dimension_numbers<[1], [0], [0], [1], [0, 0, 1, 1], [], []>} : vector<128x32xf32>, vector<32x32xf32>, vector<128x32xf32> -> vector<128x32xf32>
    %11 = vector.shape_cast %2 : vector<16x8x3xf32> to vector<128x3xf32>
    %cst_15 = arith.constant dense<0.000000e+00> : vector<128x32xf32>
    %12 = tpu.matmul %11, %4, %cst_15 {dimension_numbers = #tpu.dot_dimension_numbers<[1], [0], [0], [1], [0, 0, 1, 1], [], []>} : vector<128x3xf32>, vector<3x32xf32>, vector<128x32xf32> -> vector<128x32xf32>
    %13 = arith.addf %10, %12 : vector<128x32xf32>
    %14 = vector.shape_cast %13 : vector<128x32xf32> to vector<16x8x32xf32>
    %15 = vector.shape_cast %8 : vector<16x32xf32> to vector<16x1x32xf32>
    %16 = vector.broadcast %15 : vector<16x1x32xf32> to vector<16x8x32xf32>
    %17 = arith.subf %16, %14 : vector<16x8x32xf32>
    %cst_16 = arith.constant 0.000000e+00 : f32
    %18 = vector.broadcast %cst_16 : f32 to vector<16x8x32xf32>
    %19 = arith.cmpf ogt, %17, %18 : vector<16x8x32xf32>
    %cst_17 = arith.constant 2.000000e-01 : f32
    %20 = vector.broadcast %cst_17 : f32 to vector<16x8x32xf32>
    %21 = arith.mulf %20, %17 : vector<16x8x32xf32>
    %22 = arith.select %19, %17, %21 : vector<16x8x32xi1>, vector<16x8x32xf32>
    %cst_18 = arith.constant dense<0xFF800000> : vector<16x32xf32>
    %23 = vector.multi_reduction <maximumf>, %22, %cst_18 [1] : vector<16x8x32xf32> to vector<16x32xf32>
    %24 = vector.shape_cast %23 : vector<16x32xf32> to vector<16x1x32xf32>
    %25 = vector.broadcast %24 : vector<16x1x32xf32> to vector<16x8x32xf32>
    %26 = arith.subf %22, %25 : vector<16x8x32xf32>
    %27 = math.exp %26 : vector<16x8x32xf32>
    %cst_19 = arith.constant dense<0.000000e+00> : vector<16x32xf32>
    %28 = vector.multi_reduction <add>, %27, %cst_19 [1] : vector<16x8x32xf32> to vector<16x32xf32>
    %29 = arith.mulf %27, %3 : vector<16x8x32xf32>
    %cst_20 = arith.constant dense<0.000000e+00> : vector<16x32xf32>
    %30 = vector.multi_reduction <add>, %29, %cst_20 [1] : vector<16x8x32xf32> to vector<16x32xf32>
    %31 = tpu.reciprocal %28 {approx = true} : vector<16x32xf32> -> vector<16x32xf32>
    %32 = arith.mulf %30, %31 : vector<16x32xf32>
    %c0_21 = arith.constant 0 : index
    %c0_22 = arith.constant 0 : index
    %33 = vector.load %arg7[%c0_21, %c0_22] : memref<16x32xf32, #tpu.memory_space<vmem>>, vector<16x32xf32>
    tpu.vector_store %arg7[%c0_21, %c0_22], %32 {strides = array<i32>} : memref<16x32xf32, #tpu.memory_space<vmem>>, vector<16x32xf32>,
    return
  }
  func.func @transform_0(%arg0: i32) -> (i32, i32) {
    %c0_i32 = arith.constant 0 : i32
    %c0_i32_0 = arith.constant 0 : i32
    return %arg0, %c0_i32 : i32, i32
  }
  func.func @transform_1(%arg0: i32) -> (i32, i32) {
    %c0_i32 = arith.constant 0 : i32
    %c0_i32_0 = arith.constant 0 : i32
    return %arg0, %c0_i32 : i32, i32
  }
  func.func @transform_2(%arg0: i32) -> (i32, i32, i32) {
    %c0_i32 = arith.constant 0 : i32
    %c0_i32_0 = arith.constant 0 : i32
    %c0_i32_1 = arith.constant 0 : i32
    return %arg0, %c0_i32, %c0_i32_0 : i32, i32, i32
  }
  func.func @transform_3(%arg0: i32) -> (i32, i32, i32) {
    %c0_i32 = arith.constant 0 : i32
    %c0_i32_0 = arith.constant 0 : i32
    %c0_i32_1 = arith.constant 0 : i32
    return %arg0, %c0_i32, %c0_i32_0 : i32, i32, i32
  }
  func.func @transform_4(%arg0: i32) -> (i32, i32) {
    %c0_i32 = arith.constant 0 : i32
    %c0_i32_0 = arith.constant 0 : i32
    %c0_i32_1 = arith.constant 0 : i32
    return %c0_i32, %c0_i32_0 : i32, i32
  }
  func.func @transform_5(%arg0: i32) -> (i32, i32) {
    %c0_i32 = arith.constant 0 : i32
    %c0_i32_0 = arith.constant 0 : i32
    %c0_i32_1 = arith.constant 0 : i32
    return %c0_i32, %c0_i32_0 : i32, i32
  }
  func.func @transform_6(%arg0: i32) -> (i32, i32) {
    %c0_i32 = arith.constant 0 : i32
    %c0_i32_0 = arith.constant 0 : i32
    return %arg0, %c0_i32 : i32, i32
  }
}

</mosaic_0001>

<bundles_post_ra>
// kernel: tpu_custom_call.1
= control target key start
LH: loop header
LB: loop body
LE: loop exit
PB: predicated region body
PF: predicated region fallthrough
CT: control target
= control target key end

     0   :  { %11 = vsyncpa [#allocation3], 0  ;;  %s2832_s0 = inlined_call_operand.vmem [shape: f32[32,3], index: 0, kind: input, shape index: {}]   ;;  %s2833_s1 = inlined_call_operand.vmem [shape: f32[32,32], index: 1, kind: input, shape index: {}]   ;;  %s2834_s2 = inlined_call_operand.vmem [shape: f32[32,8,3], index: 2, kind: input, shape index: {}]   ;;  %s2835_s3 = inlined_call_operand.vmem [shape: f32[32,8,32], index: 3, kind: input, shape index: {}]   ;;  %s2836_s4 = inlined_call_operand.hbm [shape: f32[3,32], index: 4, kind: input, shape index: {}]   ;;  %s2837_s5 = inlined_call_operand.vmem [shape: f32[32,32], index: 5, kind: input, shape index: {}]   ;;  %s2838_s6 = inlined_call_operand.hbm [shape: f32[32,32], index: 6, kind: output, shape index: {}]  }
   0x1   :  { %12 = vsyncpa [#allocation4], 0 }
   0x2   :  { %14 = vsyncpa [#allocation4 + $0x1], 0  ;;  %s2208_s21 = smov 0   ;;  %s2210_s22 = smov 0  }
   0x3   :  { %s2212_s23 = smov 0   ;;  %s2214_s24 = smov 0  }
   0x4 LB: > { %s2229_s25 = sadd.s32 4294967295, %s2166_s24   ;;  %s1768_s26 = sadd.s32 4294967294, %s2166_s24   ;;  %s2166_s24 = sphi %s2214_s24, %s2846_s24   ;;  %s2162_s23 = sphi %s2212_s23, %s2845_s23   ;;  %s2158_s22 = sphi %s2210_s22, %s2844_s22   ;;  %s2154_s21 = sphi %s2208_s21, %s2843_s21  }
   0x5   : > { %s2233_s27 = sadd.s32 1, %s2166_s24   ;;  %s173_s28 = sadd.s32 1, %s2162_s23 }
   0x6   : > { %s170_s29 = ssub.s32 %s2166_s24, %s2233_s27  ;;  %p183_p0 = scmp.ne.s32.totalorder %s2162_s23, %s2158_s22 }
   0x7   : > { %p171_p1 = scmp.eq.s32.totalorder %s170_s29, 0  ;;  %p184_p2 = scmp.eq.s32.totalorder %s2229_s25, 1 }
   0x8   : > { %p189_p3 = scmp.ne.s32.totalorder %s2158_s22, %s2154_s21  ;;  %p190_p4 = scmp.eq.s32.totalorder %s1768_s26, 1 }
   0x9   : > { %s2244_s30 = scalar_select %p171_p1, %s2162_s23, %s173_s28  }
   0xa   : > { %p2246_p5 = por %p184_p2, %p183_p0  ;;  %p2250_p6 = por %p190_p4, %p189_p3 }
   0xb   : > { %p1769_p7 = scmp.ge.s32.totalorder %s2166_s24, 1  ;;  %p197_p8 = scmp.lt.s32.totalorder %s2166_s24, 3 }
   0xc   : > { %s2840_s8 = scalar_select %p2250_p6, 1, 0 }
   0xd   : > { %p1969_p9 = scmp.eq.s32.totalorder %s2229_s25, 0  ;;  %p2257_p10 = pnand %p1769_p7, %p197_p8 }
   0xe   : > { %s2168_s10 = smov [#allocation2]  }
   0xf   : > { %s210_s11 = sshll.u32 %s2168_s10, 4  ;;  %p1961_p11 = pneg %p2257_p10  ;;  %s211_s11 = int_to_ptr.vmem [resolvable:$true] %s210_s11 }
  0x10   : > { %s2087_s12 = scalar_lea.vmem %s211_s11, 64  ;;  %p2095_p3 = scmp.lt.s32.totalorder %s211_s11, %s211_s11 }
  0x11   : > { %p1962_p12 = pnand %p1969_p9, %p1961_p11  ;;  %p2088_p0 = scmp.ne.s32.totalorder %s211_s11, %s2087_s12 }
  0x12   : > { %p2096_p4 = scmp.lt.s32.totalorder %s2087_s12, %s2087_s12 }
  0x13   : > { %p2078_p13 = pneg %p1962_p12 }
  0x14   : > { %p2097_p6 = por %p2096_p4, %p2095_p3 }
  0x15   : > { %p2090_p1 = pnand %p2088_p0, %p2078_p13 }
  0x17   : > { %p2091_p2 = pneg %p2090_p1 }
  0x19   : > { %p2098_p7 = pnand %p2097_p6, %p2091_p2 }
  0x1b   : > { %2101 = shalt.err (!%p2098_p7)
}
  0x1c   : > { %1964 = dma.hbm_to_vmem [thread:$0]  (!%p1962_p12), %s2836_s4, 64, %s211_s11, [#allocation3]  }
  0x1d   : > { %262 = sbr.rel (%p2257_p10) target bundleno = 416 (0x1a0), region = 44 }
  0x22   : > { %2145 = dma.done.wait (%p1969_p9), [#allocation3], 64  }
  0x23   : > { %2147 = vsyncadd (%p1969_p9), [#allocation3], 4294967232  ;;  %s1775_s15 = sshll.u32 %s2229_s25, 1  ;;  %s1779_s16 = sshll.u32 %s2229_s25, 4  ;;  %vm380_vm0 = vcmask 1042432   ;;  %vm373_vm1 = vcmask 23552   ;;  %v933_v45 = vlaneseq }
  0x24   : > { %p308_p8 = scmp.lt.s32.totalorder %s1775_s15, 3  ;;  %p320_p6 = scmp.lt.s32.totalorder %s1779_s16, 31  ;;  %v368_v0 = vld [vmem:[#allocation2] sm:$0x7]  ;;  %v372_v1 = vld [vmem:[%s2837_s5 + $0x18] sm:$0xff]  ;;  %v371_v4 = vld [vmem:[%s2837_s5 + $0x10] sm:$0xff] }
  0x25   : > { %1873 = vmatprep.subr.msk.mxu0 %vm380_vm0, %v368_v0  ;;  %1878 = vmatprep.subr.mxu1 %v372_v1  ;;  %v370_v5 = vld [vmem:[%s2837_s5 + $0x8] sm:$0xff]  ;;  %v369_v8 = vld [vmem:[%s2837_s5] sm:$0xff]  ;;  %vm459_vm2 = vcmask 261120   ;;  %v2169_v43 = vmov 1966171168   ;;  %v934_v50 = vshrl.u32 %v933_v45, 7 }
  0x26   : > { %s2848_s15 = smov (!%p308_p8, %s1775_s15), 3  ;;  %s2850_s16 = smov (!%p320_p6, %s1779_s16), 31  ;;  %1874 = vmatpush3.msk.msra.mxu0 %vm380_vm0, %v368_v0  ;;  %1879 = vmatpush3.msra.mxu1 %v372_v1  ;;  %v931_v44 = vunpack.c.l.s4 %v2169_v43 }
  0x27   : > { %s1776_s17 = sshll.u32 %s2848_s15, 3  ;;  %s1780_s26 = sshll.u32 %s2850_s16, 3  ;;  %1880 = vmatprep.subr.mxu1 %v371_v4  ;;  %1889 = vmatprep.subr.msk.mxu0 %vm380_vm0, %v368_v0 }
  0x28   : > { %s311_s20 = scalar_lea.vmem %s2832_s0, %s1776_s17  ;;  %s2290_s11 = scalar_lea.vmem %s2834_s2, %s1780_s26  ;;  %1881 = vmatpush3.msra.mxu1 %v371_v4  ;;  %v932_v49 = vunpack.c.0.s8 %v931_v44 }
  0x29   : > { %v332_v2 = vld [vmem:[%s311_s20] sm:$0xff]  ;;  %v333_v3 = vld [vmem:[%s311_s20 + $0x8] sm:$0xff]  ;;  %s317_s20 = scalar_lea.vmem %s2833_s1, %s1776_s17  ;;  %1882 = vmatprep.subr.mxu1 %v370_v5  ;;  %v338_v11 = vld [vmem:[%s2290_s11 + $0x10] sm:$0xff]  ;;  %s2325_s10 = scalar_lea.vmem %s2835_s3, %s1780_s26 }
  0x2a   : > { %1875 = vmatprep.mubr.msk.f32.mxu0 %vm373_vm1, %v332_v2  ;;  %v336_v6 = vld [vmem:[%s2290_s11] sm:$0xff]  ;;  %v337_v7 = vld [vmem:[%s2290_s11 + $0x8] sm:$0xff]  ;;  %1883 = vmatpush3.msra.mxu1 %v370_v5  ;;  %v339_v12 = vld [vmem:[%s2290_s11 + $0x18] sm:$0xff]  ;;  %v2423_v54 = vsub.s32 %v932_v49, %v934_v50  ;;  %s304_s16 = sand.u32 1, %s2158_s22   ;;  %s1826_s12 = sshll.u32 %s2229_s25, 8 }
  0x2b   : > { %1876 = vmatmul.mubr.msk.f32.vlgmr.msra.gmra.mxu0 %vm373_vm1, %v333_v3  ;;  %v334_v9 = vld [vmem:[%s317_s20] sm:$0xff]  ;;  %v335_v10 = vld [vmem:[%s317_s20 + $0x8] sm:$0xff]  ;;  %1884 = vmatprep.subr.mxu1 %v369_v8  ;;  %v2331_v15 = vld [vmem:[%s2325_s10 + $0x10] sm:$0xff]  ;;  %s1774_s26 = sshll.u32 %s304_s16, 4  ;;  %s2782_s18 = scalar_lea.hbm %s2838_s6, %s1826_s12 }
  0x2c   : > { %1890 = vmatpush3.msk.msra.mxu0 %vm380_vm0, %v368_v0  ;;  %1891 = vmatprep.mubr.msk.f32.mxu0 %vm373_vm1, %v336_v6  ;;  %v340_v13 = vld [vmem:[%s2290_s11 + $0x20] sm:$0xff]  ;;  %v341_v14 = vld [vmem:[%s2290_s11 + $0x28] sm:$0xff]  ;;  %v342_v16 = vld [vmem:[%s2290_s11 + $0x30] sm:$0xff]  ;;  %s2792_s25 = scalar_lea.sflag [#allocation4], %s304_s16  ;;  %s2170_s20 = smov [#allocation5]  }
  0x2d   : > { %1915 = vmatprep.subr.mxu0 %v372_v1  ;;  %1885 = vmatpush3.msra.mxu1 %v369_v8  ;;  %v2336_v17 = vld [vmem:[%s2325_s10 + $0x18] sm:$0xff]  ;;  %v2342_v19 = vld [vmem:[%s2325_s10 + $0x20] sm:$0xff]  ;;  %v2352_v21 = vld [vmem:[%s2325_s10 + $0x28] sm:$0xff]  ;;  %s2106_s28 = sshll.u32 %s2170_s20, 4  ;;  %s2107_s28 = int_to_ptr.vmem [resolvable:$false] %s2106_s28 }
  0x2e   : > { %1886 = vmatprep.mubr.msk.f32.mxu1 %vm459_vm2, %v334_v9  ;;  %1947 = vmatprep.subr.mxu1 %v372_v1  ;;  %v343_v18 = vld [vmem:[%s2290_s11 + $0x38] sm:$0xff]  ;;  %v344_v20 = vld [vmem:[%s2290_s11 + $0x40] sm:$0xff]  ;;  %v345_v22 = vld [vmem:[%s2290_s11 + $0x48] sm:$0xff]  ;;  %s2108_s29 = scalar_lea.vmem %s2107_s28, 512 }
  0x2f   : > { %1892 = vmatmul.mubr.msk.f32.vlgmr.msra.gmra.mxu0 %vm373_vm1, %v337_v7  ;;  %1887 = vmatmul.mubr.msk.f32.vlgmr.msra.gmra.mxu1 %vm459_vm2, %v335_v10  ;;  %v2357_v23 = vld [vmem:[%s2325_s10 + $0x30] sm:$0xff]  ;;  %v2366_v25 = vld [vmem:[%s2325_s10 + $0x38] sm:$0xff]  ;;  %v2371_v27 = vld [vmem:[%s2325_s10 + $0x40] sm:$0xff] }
  0x30   : > { %1916 = vmatpush3.msra.mxu0 %v372_v1  ;;  %1894 = vmatprep.mubr.msk.f32.mxu0 %vm373_vm1, %v338_v11  ;;  %v346_v24 = vld [vmem:[%s2290_s11 + $0x50] sm:$0xff]  ;;  %v347_v26 = vld [vmem:[%s2290_s11 + $0x58] sm:$0xff]  ;;  %v348_v28 = vld [vmem:[%s2290_s11 + $0x60] sm:$0xff] }
  0x31   : > { %1951 = vmatpush3.msra.mxu1 %v372_v1  ;;  %1917 = vmatprep.subr.mxu0 %v371_v4  ;;  %v2380_v29 = vld [vmem:[%s2325_s10 + $0x48] sm:$0xff]  ;;  %v2385_v31 = vld [vmem:[%s2325_s10 + $0x50] sm:$0xff]  ;;  %v2394_v33 = vld [vmem:[%s2325_s10 + $0x58] sm:$0xff]  ;;  %v2433_v1 = vsub.s32 0, %v934_v50 }
  0x32   : > { %1948 = vmatprep.subr.mxu1 %v371_v4  ;;  %1918 = vmatpush3.msra.mxu0 %v371_v4  ;;  %v349_v30 = vld [vmem:[%s2290_s11 + $0x68] sm:$0xff]  ;;  %v350_v32 = vld [vmem:[%s2290_s11 + $0x70] sm:$0xff]  ;;  %v351_v34 = vld [vmem:[%s2290_s11 + $0x78] sm:$0xff]  ;;  %s2759_s11 = scalar_lea.vmem [#allocation5], %s1774_s26 }
  0x33   : > { %1895 = vmatmul.mubr.msk.f32.gmra.mxu0 %vm373_vm1, %v339_v12  ;;  %1952 = vmatpush3.msra.mxu1 %v371_v4  ;;  %v364_v35 = vld [vmem:[%s2325_s10 + $0x60] sm:$0xff]  ;;  %v365_v37 = vld [vmem:[%s2325_s10 + $0x68] sm:$0xff]  ;;  %v366_v39 = vld [vmem:[%s2325_s10 + $0x70] sm:$0xff]  ;;  %s1658_s13 = sshll.u32 %s2759_s11, 4  ;;  %s2784_s13 = int_to_ptr.vmem [resolvable:$true] %s1658_s13 }
  0x34   : > { %1897 = vmatprep.mubr.msk.f32.mxu0 %vm373_vm1, %v340_v13  ;;  %1949 = vmatprep.subr.mxu1 %v370_v5  ;;  %v2400_v36 = vld [vmem:[%s2325_s10] sm:$0xff]  ;;  %v2410_v38 = vld [vmem:[%s2325_s10 + $0x8] sm:$0xff]  ;;  %v367_v40 = vld [vmem:[%s2325_s10 + $0x78] sm:$0xff]  ;;  %s2102_s19 = scalar_lea.vmem %s2784_s13, 256  ;;  %p2109_p12 = scmp.lt.s32.totalorder %s2784_s13, %s2107_s28 }
  0x35   : > { %1953 = vmatpush3.msra.mxu1 %v370_v5  ;;  %1926 = vmatprep.mubr.msk.f32.mxu1 %vm459_vm2, %v2331_v15  ;;  %p2103_p9 = scmp.ne.s32.totalorder %s2784_s13, %s2102_s19  ;;  %p2110_p13 = scmp.lt.s32.totalorder %s2108_s29, %s2102_s19 }
  0x36   : > { %1950 = vmatprep.subr.mxu1 %v369_v8  ;;  %1919 = vmatprep.subr.mxu0 %v370_v5 }
  0x37   : > { %1898 = vmatmul.mubr.msk.f32.gmra.mxu0 %vm373_vm1, %v341_v14  ;;  %1954 = vmatpush3.msra.mxu1 %v369_v8  ;;  %p2104_p10 = pnand %p2103_p9, %p2246_p5  ;;  %p2111_p0 = por %p2110_p13, %p2109_p12 }
  0x38   : > { %1900 = vmatprep.mubr.msk.f32.mxu0 %vm373_vm1, %v342_v16  ;;  %1927 = vmatmul.mubr.msk.f32.vlgmr.msra.gmra.mxu1 %vm459_vm2, %v2336_v17 }
  0x39   : > { %1929 = vmatprep.mubr.msk.f32.mxu1 %vm459_vm2, %v2342_v19  ;;  %1920 = vmatpush3.msra.mxu0 %v370_v5  ;;  %p2105_p11 = pneg %p2104_p10 }
  0x3a   : > { %1921 = vmatprep.subr.mxu0 %v369_v8 }
  0x3b   : > { %1901 = vmatmul.mubr.msk.f32.gmra.mxu0 %vm373_vm1, %v343_v18  ;;  %p2112_p1 = pnand %p2111_p0, %p2105_p11 }
  0x3c   : > { %1903 = vmatprep.mubr.msk.f32.mxu0 %vm373_vm1, %v344_v20  ;;  %1930 = vmatmul.mubr.msk.f32.gmra.mxu1 %vm459_vm2, %v2352_v21 }
  0x3d   : > { %1922 = vmatpush3.msra.mxu0 %v369_v8  ;;  %1932 = vmatprep.mubr.msk.f32.mxu1 %vm459_vm2, %v2357_v23 }
  0x3f   : > { %1904 = vmatmul.mubr.msk.f32.gmra.mxu0 %vm373_vm1, %v345_v22 }
  0x40   : > { %1906 = vmatprep.mubr.msk.f32.mxu0 %vm373_vm1, %v346_v24  ;;  %1933 = vmatmul.mubr.msk.f32.gmra.mxu1 %vm459_vm2, %v2366_v25 }
  0x41   : > { %1935 = vmatprep.mubr.msk.f32.mxu1 %vm459_vm2, %v2371_v27 }
  0x43   : > { %1907 = vmatmul.mubr.msk.f32.gmra.mxu0 %vm373_vm1, %v347_v26 }
  0x44   : > { %1909 = vmatprep.mubr.msk.f32.mxu0 %vm373_vm1, %v348_v28  ;;  %1936 = vmatmul.mubr.msk.f32.gmra.mxu1 %vm459_vm2, %v2380_v29 }
  0x45   : > { %1938 = vmatprep.mubr.msk.f32.mxu1 %vm459_vm2, %v2385_v31 }
  0x47   : > { %1910 = vmatmul.mubr.msk.f32.gmra.mxu0 %vm373_vm1, %v349_v30 }
  0x48   : > { %1912 = vmatprep.mubr.msk.f32.mxu0 %vm373_vm1, %v350_v32  ;;  %1939 = vmatmul.mubr.msk.f32.gmra.mxu1 %vm459_vm2, %v2394_v33 }
  0x49   : > { %1941 = vmatprep.mubr.msk.f32.mxu1 %vm459_vm2, %v364_v35 }
  0x4b   : > { %1913 = vmatmul.mubr.msk.f32.gmra.mxu0 %vm373_vm1, %v351_v34 }
  0x4c   : > { %1923 = vmatprep.mubr.msk.f32.mxu0 %vm459_vm2, %v2400_v36  ;;  %1942 = vmatmul.mubr.msk.f32.gmra.mxu1 %vm459_vm2, %v365_v37 }
  0x4d   : > { %1944 = vmatprep.mubr.msk.f32.mxu1 %vm459_vm2, %v366_v39 }
  0x4f   : > { %1924 = vmatmul.mubr.msk.f32.vlgmr.msra.gmra.mxu0 %vm459_vm2, %v2410_v38 }
  0x50   : > { %1945 = vmatmul.mubr.msk.f32.gmra.mxu1 %vm459_vm2, %v367_v40 }
  0xeb   : > { %v1877_v41 = vpop.f32.mrf.mxu0 }
  0xed   : > { %v450_v42 = vpop.f32.mrf.mxu0 }
  0xef   : > { %v2419_v46 = vpop.f32.mrf.mxu0  ;;  %v1888_v48 = vpop.f32.mrf.mxu1 }
  0xf0   : > { %v2437_v3 = vadd.f32 %v1888_v48, %v1877_v41 }
  0xf1   : > { %v2421_v47 = vpop.f32.mrf.mxu0  ;;  %v532_v51 = vpop.f32.mrf.mxu1 }
  0xf2   : > { %v533_v53 = vadd.f32 %v532_v51, %v450_v42  ;;  %v2448_v20 = vrot.slane %v2437_v3, %v2423_v54 }
  0xf3   : > { %v1896_v52 = vpop.f32.mrf.mxu0 }
  0xf4   : > { %v929_v55 = vcombine.high %v533_v53, %v533_v53  ;;  %v936_v56 = vrot.slane %v533_v53, %v2423_v54  ;;  %v993_v40 = vcombine.high %v2448_v20, %v2448_v20 }
  0xf5   : > { %v665_v57 = vpop.f32.mrf.mxu0 }
  0xf6   : > { %v943_v58 = vrot.slane %v929_v55, %v2423_v54  ;;  %v944_v59 = vcombine.high %v936_v56, %v936_v56  ;;  %v2428_v60 = vrot.slane %v936_v56, %v2423_v54 }
  0xf7   : > { %v1899_v0 = vpop.f32.mrf.mxu0 }
  0xf8   : > { %v945_v61 = vcombine.high %v943_v58, %v943_v58  ;;  %v1928_v62 = vpop.f32.mrf.mxu1  ;;  %v2431_v63 = vrot.slane %v944_v59, %v2423_v54  ;;  %v974_v2 = vcombine.high %v2428_v60, %v2428_v60  ;;  %v959_v11 = vrot.slane %v943_v58, %v2423_v54 }
  0xf9   : > { %v675_v12 = vpop.f32.mrf.mxu0  ;;  %v864_v13 = vadd.f32 %v1928_v62, %v1896_v52 }
  0xfa   : > { %v858_v4 = vpop.f32.mrf.mxu1  ;;  %v973_v5 = vrot.slane %v945_v61, %v2423_v54  ;;  %v976_v6 = vcombine.high %v2431_v63, %v2431_v63  ;;  %v1038_v8 = vrot.slane %v974_v2, %v2433_v1  ;;  %v1046_v32 = vrot.slane %v959_v11, %v2433_v1 }
  0xfb   : > { %v859_v7 = vadd.f32 %v858_v4, %v665_v57  ;;  %v1902_v37 = vpop.f32.mrf.mxu0  ;;  %v975_v50 = vcombine.high %v959_v11, %v959_v11 }
  0xfc   : > { %v1931_v9 = vpop.f32.mrf.mxu1  ;;  %v1050_v10 = vrot.slane %v973_v5, %v2433_v1  ;;  %v1042_v14 = vrot.slane %v976_v6, %v2433_v1  ;;  %v977_v48 = vcombine.high %v973_v5, %v973_v5 }
  0xfd   : > { %v1109_v16 = vsub.f32 %v1038_v8, %v859_v7  ;;  %v874_v18 = vadd.f32 %v1931_v9, %v1899_v0  ;;  %v685_v57 = vpop.f32.mrf.mxu0  ;;  %v1054_v8 = vrot.slane %v975_v50, %v2433_v1 }
  0xfe   : > { %v868_v22 = vpop.f32.mrf.mxu1  ;;  %v1110_v24 = vsub.f32 %v1042_v14, %v864_v13  ;;  %v1058_v5 = vrot.slane %v977_v48, %v2433_v1 }
  0xff   : > { %vm1125_vm3 = vcmp.gt.f32.partialorder %v1109_v16, 0.0  ;;  %v1141_v26 = vmul.f32 0.2, %v1109_v16  ;;  %v1112_v28 = vsub.f32 %v1050_v10, %v874_v18  ;;  %v869_v30 = vadd.f32 %v868_v22, %v675_v12 }
 0x100   : > { %v1934_v34 = vpop.f32.mrf.mxu1  ;;  %vm1126_vm4 = vcmp.gt.f32.partialorder %v1110_v24, 0.0  ;;  %v1142_v35 = vmul.f32 0.2, %v1110_v24  ;;  %v2472_v12 = vrot.slane %v993_v40, %v2423_v54 }
 0x101   : > { %v2451_v39 = vsel %vm1125_vm3, %v1109_v16, %v1141_v26  ;;  %vm1128_vm5 = vcmp.gt.f32.partialorder %v1112_v28, 0.0  ;;  %v1144_v42 = vmul.f32 0.2, %v1112_v28  ;;  %v1111_v43 = vsub.f32 %v1046_v32, %v869_v30  ;;  %v1905_v16 = vpop.f32.mrf.mxu0 }
 0x102   : > { %v1185_v41 = vsel %vm459_vm2, %v2451_v39, -inf  ;;  %v2457_v44 = vsel %vm1126_vm4, %v1110_v24, %v1142_v35  ;;  %v878_v49 = vpop.f32.mrf.mxu1  ;;  %v884_v59 = vadd.f32 %v1934_v34, %v1902_v37  ;;  %v1066_v30 = vrot.slane %v2472_v12, %v2433_v1 }
 0x103   : > { %v1186_v45 = vrot.slane %v1185_v41, 4  ;;  %v1192_v51 = vsel %vm459_vm2, %v2457_v44, -inf  ;;  %v2461_v52 = vsel %vm1128_vm5, %v1112_v28, %v1144_v42  ;;  %vm1127_vm6 = vcmp.gt.f32.partialorder %v1111_v43, 0.0 }
 0x104   : > { %v1143_v53 = vmul.f32 0.2, %v1111_v43  ;;  %v1193_v55 = vrot.slane %v1192_v51, 4  ;;  %v1206_v58 = vsel %vm459_vm2, %v2461_v52, -inf  ;;  %v879_v0 = vadd.f32 %v878_v49, %v685_v57  ;;  %v1937_v9 = vpop.f32.mrf.mxu1 }
 0x105   : > { %v1187_v56 = vmax.f32 %v1185_v41, %v1186_v45  ;;  %v1207_v61 = vrot.slane %v1206_v58, 4  ;;  %v1114_v11 = vsub.f32 %v1058_v5, %v884_v59  ;;  %v894_v24 = vadd.f32 %v1937_v9, %v1905_v16 }
 0x106   : > { %v2465_v62 = vsel %vm1127_vm6, %v1111_v43, %v1143_v53  ;;  %v1194_v2 = vmax.f32 %v1192_v51, %v1193_v55  ;;  %v1113_v18 = vsub.f32 %v1054_v8, %v879_v0  ;;  %v888_v43 = vpop.f32.mrf.mxu1  ;;  %v2480_v45 = vrot.slane %v2448_v20, %v2423_v54  ;;  %v695_v53 = vpop.f32.mrf.mxu0 }
 0x107   : > { %v1188_v4 = vrot.slane %v1187_v56, 2  ;;  %v1208_v6 = vmax.f32 %v1206_v58, %v1207_v61  ;;  %v1199_v7 = vsel %vm459_vm2, %v2465_v62, -inf  ;;  %v1146_v28 = vmul.f32 0.2, %v1114_v11 }
 0x108   : > { %v1195_v10 = vrot.slane %v1194_v2, 2  ;;  %v1200_v22 = vrot.slane %v1199_v7, 4  ;;  %vm1130_vm7 = vcmp.gt.f32.partialorder %v1114_v11, 0.0  ;;  %v1145_v35 = vmul.f32 0.2, %v1113_v18 }
 0x109   : > { %v1189_v13 = vmax.f32 %v1187_v56, %v1188_v4  ;;  %v1209_v14 = vrot.slane %v1208_v6, 2  ;;  %vm1129_vm8 = vcmp.gt.f32.partialorder %v1113_v18, 0.0  ;;  %v1116_v41 = vsub.f32 %v1066_v30, %v894_v24 }
 0x10a   : > { %v1196_v26 = vmax.f32 %v1194_v2, %v1195_v10  ;;  %v1201_v37 = vmax.f32 %v1199_v7, %v1200_v22  ;;  %v2476_v42 = vsel %vm1130_vm7, %v1114_v11, %v1146_v28  ;;  %v2482_v50 = vsel %vm1129_vm8, %v1113_v18, %v1145_v35  ;;  %v1940_v28 = vpop.f32.mrf.mxu1 }
 0x10b   : > { %v1190_v32 = vrot.slane %v1189_v13, 1  ;;  %v1210_v34 = vmax.f32 %v1208_v6, %v1209_v14  ;;  %v1148_v55 = vmul.f32 0.2, %v1116_v41  ;;  %v1220_v57 = vsel %vm459_vm2, %v2476_v42, -inf  ;;  %v1908_v14 = vpop.f32.mrf.mxu0 }
 0x10c   : > { %v1197_v40 = vrot.slane %v1196_v26, 1  ;;  %v1202_v51 = vrot.slane %v1201_v37, 2  ;;  %vm1132_vm9 = vcmp.gt.f32.partialorder %v1116_v41, 0.0  ;;  %v889_v58 = vadd.f32 %v888_v43, %v695_v53 }
 0x10d   : > { %v1191_v48 = vmax.f32 %v1189_v13, %v1190_v32  ;;  %v1211_v49 = vrot.slane %v1210_v34, 1  ;;  %v1213_v59 = vsel %vm459_vm2, %v2482_v50, -inf  ;;  %v1062_v0 = vrot.slane %v2480_v45, %v2433_v1 }
 0x10e   : > { %v1198_v56 = vmax.f32 %v1196_v26, %v1197_v40  ;;  %v1203_v2 = vmax.f32 %v1201_v37, %v1202_v51  ;;  %v1221_v4 = vrot.slane %v1220_v57, 4  ;;  %v2491_v5 = vsel %vm1132_vm9, %v1116_v41, %v1148_v55 }
 0x10f   : > { %v1285_v61 = vsub.f32 %v2451_v39, %v1191_v48  ;;  %v1212_v20 = vmax.f32 %v1210_v34, %v1211_v49  ;;  %v1214_v7 = vrot.slane %v1213_v59, 4  ;;  %v1115_v8 = vsub.f32 %v1062_v0, %v889_v58 }
 0x110   : > { %v1286_v6 = vsub.f32 %v2457_v44, %v1198_v56  ;;  %v1234_v11 = vsel %vm459_vm2, %v2491_v5, -inf  ;;  %v1204_v13 = vrot.slane %v1203_v2, 1  ;;  %v1222_v39 = vmax.f32 %v1220_v57, %v1221_v4 }
 0x111   : > { %v1303_v9 = vmul.f32 1.442695, %v1285_v61  ;;  %v1288_v10 = vsub.f32 %v2461_v52, %v1212_v20  ;;  %v1215_v18 = vmax.f32 %v1213_v59, %v1214_v7  ;;  %v1147_v22 = vmul.f32 0.2, %v1115_v8  ;;  %v705_v52 = vpop.f32.mrf.mxu0 }
 0x112   : > { %v1305_v16 = vmul.f32 1.442695, %v1286_v6  ;;  %v978_v24 = vcombine.high %v2437_v3, %v2437_v3  ;;  %v1235_v26 = vrot.slane %v1234_v11, 4  ;;  %vm1131_vm10 = vcmp.gt.f32.partialorder %v1115_v8, 0.0  ;;  %v898_v3 = vpop.f32.mrf.mxu1 }
 0x113   : > { %2008 = vpow2.f32 %v1303_v9  ;;  %v1309_v44 = vmul.f32 1.442695, %v1288_v10  ;;  %v1205_v30 = vmax.f32 %v1203_v2, %v1204_v13  ;;  %v1223_v32 = vrot.slane %v1222_v39, 2  ;;  %v1911_v53 = vpop.f32.mrf.mxu0 }
 0x114   : > { %v1025_v34 = vcombine.high %v2472_v12, %v2472_v12  ;;  %2010 = vpow2.f32 %v1305_v16  ;;  %v1216_v35 = vrot.slane %v1215_v18, 2  ;;  %v2501_v37 = vsel %vm1131_vm10, %v1115_v8, %v1147_v22  ;;  %v1943_v9 = vpop.f32.mrf.mxu1 }
 0x115   : > { %v992_v41 = vrot.slane %v978_v24, %v2423_v54  ;;  %v1236_v40 = vmax.f32 %v1234_v11, %v1235_v26  ;;  %v904_v43 = vadd.f32 %v1940_v28, %v1908_v14  ;;  %2012 = vpow2.f32 %v1309_v44  ;;  %v2510_v4 = vpop.f32.mrf.mxu0 }
 0x116   : > { %v1023_v48 = vcombine.high %v2480_v45, %v2480_v45  ;;  %v1287_v49 = vsub.f32 %v2465_v62, %v1205_v30  ;;  %v1224_v51 = vmax.f32 %v1222_v39, %v1223_v32  ;;  %v1227_v12 = vsel %vm459_vm2, %v2501_v37, -inf }
 0x117   : > { %v1074_v55 = vrot.slane %v1025_v34, %v2433_v1  ;;  %v1217_v56 = vmax.f32 %v1215_v18, %v1216_v35  ;;  %v994_v57 = vcombine.high %v992_v41, %v992_v41  ;;  %v1237_v58 = vrot.slane %v1236_v40, 2  ;;  %v2514_v14 = vpop.f32.mrf.mxu0 }
 0x118   : > { %v899_v61 = vadd.f32 %v898_v3, %v705_v52  ;;  %v1228_v20 = vrot.slane %v1227_v12, 4  ;;  %v1307_v0 = vmul.f32 1.442695, %v1287_v49  ;;  %v1225_v2 = vrot.slane %v1224_v51, 1 }
 0x119   : > { %v1118_v59 = vsub.f32 %v1074_v55, %v904_v43  ;;  %v1070_v45 = vrot.slane %v1023_v48, %v2433_v1  ;;  %v1218_v62 = vrot.slane %v1217_v56, 1  ;;  %v1238_v6 = vmax.f32 %v1236_v40, %v1237_v58 }
 0x11a   : > { %v1022_v10 = vrot.slane %v994_v57, %v2423_v54  ;;  %v1229_v11 = vmax.f32 %v1227_v12, %v1228_v20  ;;  %2014 = vpow2.f32 %v1307_v0  ;;  %v1226_v39 = vmax.f32 %v1224_v51, %v1225_v2 }
 0x11b   : > { %v1150_v7 = vmul.f32 0.2, %v1118_v59  ;;  %v1117_v8 = vsub.f32 %v1070_v45, %v899_v61  ;;  %vm1134_vm11 = vcmp.gt.f32.partialorder %v1118_v59, 0.0  ;;  %v2517_v16 = vrot.slane %v992_v41, %v2423_v54  ;;  %v2525_v54 = vpop.f32.mrf.mxu0 }
 0x11c   : > { %v1219_v18 = vmax.f32 %v1217_v56, %v1218_v62  ;;  %v914_v22 = vadd.f32 %v1943_v9, %v1911_v53  ;;  %v1239_v26 = vrot.slane %v1238_v6, 1  ;;  %v1082_v30 = vrot.slane %v1022_v10, %v2433_v1 }
 0x11d   : > { %v2519_v44 = vsel %vm1134_vm11, %v1118_v59, %v1150_v7  ;;  %v1149_v28 = vmul.f32 0.2, %v1117_v8  ;;  %v1230_v34 = vrot.slane %v1229_v11, 2  ;;  %vm1133_vm12 = vcmp.gt.f32.partialorder %v1117_v8, 0.0  ;;  %v1925_v59 = vpop.f32.mrf.mxu0 }
 0x11e   : > { %v1290_v40 = vsub.f32 %v2476_v42, %v1226_v39  ;;  %v1034_v41 = vrot.slane %v2431_v63, %v2433_v1  ;;  %v1078_v43 = vrot.slane %v2517_v16, %v2433_v1  ;;  %v1289_v48 = vsub.f32 %v2482_v50, %v1219_v18 }
 0x11f   : > { %v1120_v49 = vsub.f32 %v1082_v30, %v914_v22  ;;  %v1248_v42 = vsel %vm459_vm2, %v2519_v44, -inf  ;;  %v2538_v12 = vsel %vm1133_vm12, %v1117_v8, %v1149_v28  ;;  %v1240_v56 = vmax.f32 %v1238_v6, %v1239_v26 }
 0x120   : > { %v2009_v13 = vpop.eup %2008  ;;  %v1231_v57 = vmax.f32 %v1229_v11, %v1230_v34  ;;  %v1313_v50 = vmul.f32 1.442695, %v1290_v40  ;;  %v1026_v61 = vcombine.high %v1022_v10, %v1022_v10  ;;  %v1024_v20 = vcombine.high %v2517_v16, %v2517_v16 }
 0x121   : > { %v2011_v24 = vpop.eup %2010  ;;  %v1345_v32 = vsel %vm459_vm2, %v2009_v13, 0.0  ;;  %v1445_v52 = vmul.f32 %v2009_v13, %v2331_v15  ;;  %v1030_v15 = vrot.slane %v2428_v60, %v2433_v1  ;;  %v1249_v0 = vrot.slane %v1248_v42, 4 }
 0x122   : > { %v2013_v35 = vpop.eup %2012  ;;  %v1352_v3 = vsel %vm459_vm2, %v2011_v24, 0.0  ;;  %v1446_v51 = vmul.f32 %v2011_v24, %v2336_v17  ;;  %v1346_v53 = vrot.slane %v1345_v32, 4  ;;  %v1311_v17 = vmul.f32 1.442695, %v1289_v48 }
 0x123   : > { %v1473_v63 = vsel %vm459_vm2, %v1445_v52, 0.0  ;;  %v1366_v55 = vsel %vm459_vm2, %v2013_v35, 0.0  ;;  %v1353_v58 = vrot.slane %v1352_v3, 4  ;;  %v1241_v2 = vsel %vm459_vm2, %v2538_v12, -inf }
 0x124   : > { %v1152_v45 = vmul.f32 0.2, %v1120_v49  ;;  %v1480_v62 = vsel %vm459_vm2, %v1446_v51, 0.0  ;;  %v1347_v7 = vadd.f32 %v1346_v53, %v1345_v32  ;;  %v1474_v8 = vrot.slane %v1473_v63, 4  ;;  %v908_v32 = vpop.f32.mrf.mxu1 }
 0x125   : > { %v1367_v9 = vrot.slane %v1366_v55, 4  ;;  %v1292_v6 = vsub.f32 %v2491_v5, %v1240_v56  ;;  %v1232_v11 = vrot.slane %v1231_v57, 1  ;;  %vm1136_vm13 = vcmp.gt.f32.partialorder %v1120_v49, 0.0 }
 0x126   : > { %v854_v10 = vadd.f32 %v1925_v59, %v2419_v46  ;;  %v1354_v13 = vadd.f32 %v1353_v58, %v1352_v3  ;;  %v1448_v39 = vmul.f32 %v2013_v35, %v2352_v21  ;;  %v2551_v18 = vrot.slane %v1026_v61, %v2433_v1 }
 0x127   : > { %v2554_v22 = vrot.slane %v1024_v20, %v2433_v1  ;;  %v2015_v24 = vpop.eup %2014  ;;  %v1481_v26 = vrot.slane %v1480_v62, 4  ;;  %2016 = vpow2.f32 %v1313_v50  ;;  %v1250_v28 = vmax.f32 %v1248_v42, %v1249_v0  ;;  %v848_v42 = vpop.f32.mrf.mxu0 }
 0x128   : > { %v1242_v30 = vrot.slane %v1241_v2, 4  ;;  %v1348_v5 = vrot.slane %v1347_v7, 2  ;;  %v1475_v52 = vadd.f32 %v1474_v8, %v1473_v63  ;;  %v1368_v34 = vadd.f32 %v1367_v9, %v1366_v55 }
 0x129   : > { %v2556_v40 = vsel %vm1136_vm13, %v1120_v49, %v1152_v45  ;;  %2018 = vpow2.f32 %v1311_v17  ;;  %v1317_v46 = vmul.f32 1.442695, %v1292_v6  ;;  %v2558_v21 = vmax.f32 %v1231_v57, %v1232_v11 }
 0x12a   : > { %v1108_v35 = vsub.f32 %v1034_v41, %v854_v10  ;;  %v1355_v3 = vrot.slane %v1354_v13, 2  ;;  %v1494_v48 = vsel %vm459_vm2, %v1448_v39, 0.0  ;;  %v1447_v51 = vmul.f32 %v2015_v24, %v2342_v19 }
 0x12b   : > { %v909_v53 = vadd.f32 %v908_v32, %v2510_v4  ;;  %v1482_v56 = vadd.f32 %v1481_v26, %v1480_v62  ;;  %v1359_v58 = vsel %vm459_vm2, %v2015_v24, 0.0  ;;  %v1251_v63 = vrot.slane %v1250_v28, 2 }
 0x12c   : > { %v1262_v49 = vsel %vm459_vm2, %v2556_v40, -inf  ;;  %v1349_v55 = vadd.f32 %v1348_v5, %v1347_v7  ;;  %v1476_v50 = vrot.slane %v1475_v52, 2  ;;  %v1369_v57 = vrot.slane %v1368_v34, 2 }
 0x12d   : > { %v1243_v59 = vmax.f32 %v1241_v2, %v1242_v30  ;;  %v1495_v41 = vrot.slane %v1494_v48, 4  ;;  %2020 = vpow2.f32 %v1317_v46  ;;  %v1291_v61 = vsub.f32 %v2501_v37, %v2558_v21 }
 0x12e   : > { %v849_v19 = vadd.f32 %v848_v42, %v2421_v47  ;;  %v1356_v4 = vadd.f32 %v1355_v3, %v1354_v13  ;;  %v1360_v20 = vrot.slane %v1359_v58, 4  ;;  %v1487_v17 = vsel %vm459_vm2, %v1447_v51, 0.0 }
 0x12f   : > { %v1263_v0 = vrot.slane %v1262_v49, 4  ;;  %v1483_v45 = vrot.slane %v1482_v56, 2  ;;  %v1252_v62 = vmax.f32 %v1250_v28, %v1251_v63  ;;  %vm1124_vm14 = vcmp.gt.f32.partialorder %v1108_v35, 0.0 }
 0x130   : > { %v1140_v8 = vmul.f32 0.2, %v1108_v35  ;;  %v1350_v7 = vrot.slane %v1349_v55, 1  ;;  %v1477_v9 = vadd.f32 %v1476_v50, %v1475_v52  ;;  %v1370_v6 = vadd.f32 %v1369_v57, %v1368_v34  ;;  %v1946_v52 = vpop.f32.mrf.mxu1 }
 0x131   : > { %v1244_v2 = vrot.slane %v1243_v59, 2  ;;  %v1264_v11 = vmax.f32 %v1262_v49, %v1263_v0  ;;  %v1119_v47 = vsub.f32 %v1078_v43, %v909_v53  ;;  %v1107_v13 = vsub.f32 %v1030_v15, %v849_v19 }
 0x132   : > { %v2570_v10 = vsel %vm1124_vm14, %v1108_v35, %v1140_v8  ;;  %v2578_v39 = vadd.f32 %v1495_v41, %v1494_v48  ;;  %v1361_v24 = vadd.f32 %v1360_v20, %v1359_v58  ;;  %v1488_v26 = vrot.slane %v1487_v17, 4 }
 0x133   : > { %v1178_v28 = vsel %vm459_vm2, %v2570_v10, -inf  ;;  %v1253_v30 = vrot.slane %v1252_v62, 1  ;;  %vm1135_vm15 = vcmp.gt.f32.partialorder %v1119_v47, 0.0  ;;  %v1151_v5 = vmul.f32 0.2, %v1119_v47 }
 0x134   : > { %v1179_v32 = vrot.slane %v1178_v28, 4  ;;  %v2582_v34 = vpop.eup %2016  ;;  %v1357_v16 = vrot.slane %v1356_v4, 1  ;;  %v2584_v43 = vadd.f32 %v1483_v45, %v1482_v56  ;;  %vm1123_vm0 = vcmp.gt.f32.partialorder %v1107_v13, 0.0 }
 0x135   : > { %v1139_v60 = vmul.f32 0.2, %v1107_v13  ;;  %v1245_v1 = vmax.f32 %v1243_v59, %v1244_v2  ;;  %v1265_v15 = vrot.slane %v1264_v11, 2  ;;  %v2586_v35 = vsel %vm1135_vm15, %v1119_v47, %v1151_v5 }
 0x136   : > { %v1180_v46 = vmax.f32 %v1178_v28, %v1179_v32  ;;  %v2019_v3 = vpop.eup %2018  ;;  %v1351_v48 = vadd.f32 %v1350_v7, %v1349_v55  ;;  %v1478_v51 = vrot.slane %v1477_v9, 1  ;;  %v1371_v53 = vrot.slane %v1370_v6, 1 }
 0x137   : > { %v924_v42 = vadd.f32 %v1946_v52, %v2514_v14  ;;  %v1254_v58 = vmax.f32 %v1252_v62, %v1253_v30  ;;  %v1255_v49 = vsel %vm459_vm2, %v2586_v35, -inf  ;;  %v2591_v56 = vsel %vm1123_vm0, %v1107_v13, %v1139_v60  ;;  %v918_v30 = vpop.f32.mrf.mxu1 }
 0x138   : > { %v1181_v63 = vrot.slane %v1180_v46, 2  ;;  %v1497_v50 = vrot.slane %v2578_v39, 2  ;;  %v1362_v57 = vrot.slane %v1361_v24, 2  ;;  %v2594_v59 = vadd.f32 %v1488_v26, %v1487_v17 }
 0x139   : > { %v1256_v41 = vrot.slane %v1255_v49, 4  ;;  %v1246_v19 = vrot.slane %v1245_v1, 1  ;;  %v1266_v20 = vmax.f32 %v1264_v11, %v1265_v15  ;;  %v1171_v0 = vsel %vm459_vm2, %v2591_v56, -inf }
 0x13a   : > { %v1182_v55 = vmax.f32 %v1180_v46, %v1181_v63  ;;  %v2598_v14 = vpop.eup %2020  ;;  %v1358_v45 = vadd.f32 %v1357_v16, %v1356_v4  ;;  %v1172_v8 = vrot.slane %v1171_v0, 4  ;;  %v1122_v7 = vsub.f32 %v2551_v18, %v924_v42 }
 0x13b   : > { %v1257_v62 = vmax.f32 %v1255_v49, %v1256_v41  ;;  %v1485_v2 = vrot.slane %v2584_v43, 1  ;;  %v2602_v47 = vadd.f32 %v1478_v51, %v1477_v9  ;;  %v1294_v17 = vsub.f32 %v2519_v44, %v1254_v58 }
 0x13c   : > { %v1183_v13 = vrot.slane %v1182_v55, 1  ;;  %2022 = vrcp.f32 %v1351_v48  ;;  %v1380_v11 = vsel %vm459_vm2, %v2582_v34, 0.0  ;;  %v1173_v28 = vmax.f32 %v1171_v0, %v1172_v8 }
 0x13d   : > { %v1258_v26 = vrot.slane %v1257_v62, 2  ;;  %v1315_v4 = vmul.f32 1.442695, %v1291_v61  ;;  %v1247_v32 = vmax.f32 %v1245_v1, %v1246_v19  ;;  %v1267_v18 = vrot.slane %v1266_v20, 1 }
 0x13e   : > { %v1184_v5 = vmax.f32 %v1182_v55, %v1183_v13  ;;  %v2610_v52 = vadd.f32 %v1371_v53, %v1370_v6  ;;  %v2612_v9 = vadd.f32 %v1362_v57, %v1361_v24  ;;  %v1154_v16 = vmul.f32 0.2, %v1122_v7 }
 0x13f   : > { %v1259_v44 = vmax.f32 %v1257_v62, %v1258_v26  ;;  %v1381_v60 = vrot.slane %v1380_v11, 4  ;;  %v1321_v15 = vmul.f32 1.442695, %v1294_v17  ;;  %vm1138_vm1 = vcmp.gt.f32.partialorder %v1122_v7, 0.0 }
 0x140   : > { %v919_v46 = vadd.f32 %v918_v30, %v2525_v54  ;;  %v1373_v48 = vsel %vm459_vm2, %v2019_v3, 0.0  ;;  %v1284_v51 = vsub.f32 %v2570_v10, %v1184_v5  ;;  %v1174_v21 = vrot.slane %v1173_v28, 2 }
 0x141   : > { %v1260_v37 = vrot.slane %v1259_v44, 1  ;;  %v1449_v61 = vmul.f32 %v2019_v3, %v2357_v23  ;;  %2024 = vpow2.f32 %v1315_v4  ;;  %v1293_v6 = vsub.f32 %v2538_v12, %v1247_v32 }
 0x142   : > { %v1268_v24 = vmax.f32 %v1266_v20, %v1267_v18  ;;  %v1301_v1 = vmul.f32 1.442695, %v1284_v51  ;;  %v1175_v42 = vmax.f32 %v1173_v28, %v1174_v21  ;;  %v2619_v58 = vsel %vm1138_vm1, %v1122_v7, %v1154_v16 }
 0x143   : > { %v1261_v53 = vmax.f32 %v1259_v44, %v1260_v37  ;;  %v1382_v63 = vadd.f32 %v1381_v60, %v1380_v11  ;;  %v1450_v54 = vmul.f32 %v2582_v34, %v2366_v25  ;;  %2026 = vpow2.f32 %v1321_v15 }
 0x144   : > { %v1121_v10 = vsub.f32 %v2554_v22, %v919_v46  ;;  %v1374_v49 = vrot.slane %v1373_v48, 4  ;;  %2028 = vpow2.f32 %v1301_v1  ;;  %v1176_v57 = vrot.slane %v1175_v42, 1 }
 0x145   : > { %v1276_v23 = vsel %vm459_vm2, %v2619_v58, -inf  ;;  %v1501_v12 = vsel %vm459_vm2, %v1449_v61, 0.0  ;;  %v1319_v3 = vmul.f32 1.442695, %v1293_v6  ;;  %v1295_v41 = vsub.f32 %v2586_v35, %v1261_v53 }
 0x146   : > { %v1277_v19 = vrot.slane %v1276_v23, 4  ;;  %2030 = vrcp.f32 %v1358_v45  ;;  %v1490_v20 = vrot.slane %v2594_v59, 2  ;;  %v1296_v25 = vsub.f32 %v2556_v40, %v1268_v24 }
 0x147   : > { %v1177_v34 = vmax.f32 %v1175_v42, %v1176_v57  ;;  %v1508_v22 = vsel %vm459_vm2, %v1450_v54, 0.0  ;;  %v1394_v55 = vsel %vm459_vm2, %v2598_v14, 0.0  ;;  %vm1137_vm3 = vcmp.gt.f32.partialorder %v1121_v10, 0.0 }
 0x148   : > { %v1278_v0 = vmax.f32 %v1276_v23, %v1277_v19  ;;  %v1383_v62 = vrot.slane %v1382_v63, 2  ;;  %v1502_v8 = vrot.slane %v1501_v12, 4  ;;  %v1153_v17 = vmul.f32 0.2, %v1121_v10 }
 0x149   : > { %v1283_v7 = vsub.f32 %v2591_v56, %v1177_v34  ;;  %v2023_v35 = vpop.eup %2022  ;;  %v1375_v13 = vadd.f32 %v1374_v49, %v1373_v48  ;;  %v1452_v45 = vmul.f32 %v2598_v14, %v2380_v29  ;;  %2032 = vpow2.f32 %v1319_v3 }
 0x14a   : > { %v1323_v40 = vmul.f32 1.442695, %v1295_v41  ;;  %v1325_v11 = vmul.f32 1.442695, %v1296_v25  ;;  %v1279_v28 = vrot.slane %v1278_v0, 2  ;;  %v2636_v30 = vsel %vm1137_vm3, %v1121_v10, %v1153_v17 }
 0x14b   : > { %v1299_v26 = vmul.f32 1.442695, %v1283_v7  ;;  %v1498_v4 = vadd.f32 %v1497_v50, %v2578_v39  ;;  %v1364_v32 = vrot.slane %v2612_v9, 1  ;;  %v1491_v56 = vadd.f32 %v1490_v20, %v2594_v59 }
 0x14c   : > { %v1395_v18 = vrot.slane %v1394_v55, 4  ;;  %v1509_v5 = vrot.slane %v1508_v22, 4  ;;  %v1503_v44 = vadd.f32 %v1502_v8, %v1501_v12  ;;  %v1280_v29 = vmax.f32 %v1278_v0, %v1279_v28 }
 0x14d   : > { %2034 = vpow2.f32 %v1299_v26  ;;  %v1384_v14 = vadd.f32 %v1383_v62, %v1382_v63  ;;  %v1376_v16 = vrot.slane %v1375_v13, 2  ;;  %v1269_v60 = vsel %vm459_vm2, %v2636_v30, -inf }
 0x14e   : > { %2036 = vpow2.f32 %v1323_v40  ;;  %v2025_v15 = vpop.eup %2024  ;;  %v1522_v46 = vsel %vm459_vm2, %v1452_v45, 0.0  ;;  %v1281_v39 = vrot.slane %v1280_v29, 1  ;;  %v1270_v50 = vrot.slane %v1269_v60, 4 }
 0x14f   : > { %2038 = vpow2.f32 %v1325_v11  ;;  %v1486_v59 = vadd.f32 %v1485_v2, %v2584_v43  ;;  %v1499_v48 = vrot.slane %v1498_v4, 1  ;;  %v1492_v51 = vrot.slane %v1491_v56, 1 }
 0x150   : > { %v1396_v37 = vadd.f32 %v1395_v18, %v1394_v55  ;;  %v2649_v21 = vpop.eup %2026  ;;  %2040 = vrcp.f32 %v2610_v52  ;;  %v1504_v61 = vrot.slane %v1503_v44, 2  ;;  %v1282_v6 = vmax.f32 %v1280_v29, %v1281_v39 }
 0x151   : > { %v1271_v24 = vmax.f32 %v1269_v60, %v1270_v50  ;;  %v2029_v1 = vpop.eup %2028  ;;  %v1365_v53 = vadd.f32 %v1364_v32, %v2612_v9  ;;  %v1385_v42 = vrot.slane %v1384_v14, 1  ;;  %v2653_v63 = vadd.f32 %v1509_v5, %v1508_v22 }
 0x152   : > { %v1523_v54 = vrot.slane %v1522_v46, 4  ;;  %v1377_v10 = vadd.f32 %v1376_v16, %v1375_v13  ;;  %v1387_v43 = vsel %vm459_vm2, %v2025_v15, 0.0  ;;  %v1338_v2 = vsel %vm459_vm2, %v2029_v1, 0.0 }
 0x153   : > { %v1298_v49 = vsub.f32 %v2619_v58, %v1282_v6  ;;  %v2031_v57 = vpop.eup %2030  ;;  %v2658_v23 = vadd.f32 %v1499_v48, %v1498_v4  ;;  %v2660_v52 = vadd.f32 %v1492_v51, %v1491_v56  ;;  %v1397_v12 = vrot.slane %v1396_v37, 2 }
 0x154   : > { %v1339_v3 = vrot.slane %v1338_v2, 4  ;;  %v2662_v41 = vadd.f32 %v1504_v61, %v1503_v44  ;;  %v1408_v9 = vsel %vm459_vm2, %v2649_v21, 0.0  ;;  %v1272_v20 = vrot.slane %v1271_v24, 2 }
 0x155   : > { %v1329_v19 = vmul.f32 1.442695, %v1298_v49  ;;  %2042 = vrcp.f32 %v1365_v53  ;;  %v2666_v25 = vadd.f32 %v1523_v54, %v1522_v46  ;;  %v1388_v34 = vrot.slane %v1387_v43, 4 }
 0x156   : > { %v1340_v22 = vadd.f32 %v1339_v3, %v1338_v2  ;;  %v2033_v58 = vpop.eup %2032  ;;  %v1386_v55 = vadd.f32 %v1385_v42, %v1384_v14  ;;  %v1511_v0 = vrot.slane %v2653_v63, 2  ;;  %v1378_v62 = vrot.slane %v1377_v10, 1 }
 0x157   : > { %2044 = vpow2.f32 %v1329_v19  ;;  %v2670_v8 = vmul.f32 %v2023_v35, %v2602_v47  ;;  %v1409_v7 = vrot.slane %v1408_v9, 4  ;;  %v1444_v13 = vmul.f32 %v2029_v1, %v2410_v38 }
 0x158   : > { %v1341_v17 = vrot.slane %v1340_v22, 2  ;;  %v1506_v45 = vrot.slane %v2662_v41, 1  ;;  %v2674_v40 = vadd.f32 %v1397_v12, %v1396_v37  ;;  %v1451_v11 = vmul.f32 %v2025_v15, %v2371_v27 }
 0x159   : > { %v1273_v26 = vmax.f32 %v1271_v24, %v1272_v20  ;;  %v1525_v4 = vrot.slane %v2666_v25, 2  ;;  %v1389_v32 = vadd.f32 %v1388_v34, %v1387_v43  ;;  %v1401_v56 = vsel %vm459_vm2, %v2033_v58, 0.0 }
 0x15a   : > { %v2035_v28 = vpop.eup %2034  ;;  %v1342_v18 = vadd.f32 %v1341_v17, %v1340_v22  ;;  %v2681_v35 = vmul.f32 %v2031_v57, %v1486_v59  ;;  %2046 = vrcp.f32 %v1386_v55  ;;  %v1379_v38 = vadd.f32 %v1378_v62, %v1377_v10 }
 0x15b   : > { %v2679_v47 = vpop.eup %2036  ;;  %v1331_v5 = vsel %vm459_vm2, %v2035_v28, 0.0  ;;  %v1410_v29 = vadd.f32 %v1409_v7, %v1408_v9  ;;  %v1466_v27 = vsel %vm459_vm2, %v1444_v13, 0.0  ;;  %v1443_v16 = vmul.f32 %v2035_v28, %v2400_v36 }
 0x15c   : > { %v2039_v44 = vpop.eup %2038  ;;  %v1332_v14 = vrot.slane %v1331_v5, 4  ;;  %v1515_v60 = vsel %vm459_vm2, %v1451_v11, 0.0  ;;  %v1402_v15 = vrot.slane %v1401_v56, 4  ;;  %v1343_v46 = vrot.slane %v1342_v18, 1 }
 0x15d   : > { %v1274_v39 = vrot.slane %v1273_v26, 1  ;;  %v2687_v50 = vpop.eup %2040  ;;  %v1390_v59 = vrot.slane %v1389_v32, 2  ;;  %v1415_v48 = vsel %vm459_vm2, %v2679_v47, 0.0  ;;  %v1459_v37 = vsel %vm459_vm2, %v1443_v16, 0.0 }
 0x15e   : > { %v1333_v51 = vadd.f32 %v1332_v14, %v1331_v5  ;;  %v1453_v61 = vmul.f32 %v2033_v58, %v2385_v31  ;;  %v1422_v6 = vsel %vm459_vm2, %v2039_v44, 0.0  ;;  %v1467_v24 = vrot.slane %v1466_v27, 4  ;;  %v2072_v5 = vld [vmem:[%s2325_s10 + $0x68] sm:$0xff] }
 0x15f   : > { %v1275_v36 = vmax.f32 %v1273_v26, %v1274_v39  ;;  %v1411_v1 = vrot.slane %v1410_v29, 2  ;;  %v1454_v53 = vmul.f32 %v2649_v21, %v2394_v33  ;;  %v1460_v54 = vrot.slane %v1459_v37, 4 }
 0x160   : > { %v1334_v42 = vrot.slane %v1333_v51, 2  ;;  %v1403_v10 = vadd.f32 %v1402_v15, %v1401_v56  ;;  %v1344_v43 = vadd.f32 %v1343_v46, %v1342_v18  ;;  %v1416_v2 = vrot.slane %v1415_v48, 4 }
 0x161   : > { %v1297_v49 = vsub.f32 %v2636_v30, %v1275_v36  ;;  %v1399_v57 = vrot.slane %v2674_v40, 1  ;;  %v1516_v12 = vrot.slane %v1515_v60, 4  ;;  %v1423_v3 = vrot.slane %v1422_v6, 4 }
 0x162   : > { %v1335_v31 = vadd.f32 %v1334_v42, %v1333_v51  ;;  %v2698_v9 = vpop.eup %2042  ;;  %v1391_v19 = vadd.f32 %v1390_v59, %v1389_v32  ;;  %v1529_v20 = vsel %vm459_vm2, %v1453_v61, 0.0  ;;  %v1468_v34 = vadd.f32 %v1467_v24, %v1466_v27  ;;  %v2073_v24 = vld [vmem:[%s2325_s10 + $0x60] sm:$0xff] }
 0x163   : > { %v1327_v22 = vmul.f32 1.442695, %v1297_v49  ;;  %v1412_v21 = vadd.f32 %v1411_v1, %v1410_v29  ;;  %v1536_v58 = vsel %vm459_vm2, %v1454_v53, 0.0  ;;  %v1461_v30 = vadd.f32 %v1460_v54, %v1459_v37 }
 0x164   : > { %v2701_v33 = vpop.eup %2044  ;;  %v1336_v55 = vrot.slane %v1335_v31, 1  ;;  %v1404_v62 = vrot.slane %v1403_v10, 2  ;;  %2048 = vrcp.f32 %v1344_v43  ;;  %v1417_v7 = vadd.f32 %v1416_v2, %v1415_v48 }
 0x165   : > { %v1436_v17 = vsel %vm459_vm2, %v2701_v33, 0.0  ;;  %v1530_v13 = vrot.slane %v1529_v20, 4  ;;  %v1424_v11 = vadd.f32 %v1423_v3, %v1422_v6  ;;  %2050 = vpow2.f32 %v1327_v22 }
 0x166   : > { %v1337_v26 = vadd.f32 %v1336_v55, %v1335_v31  ;;  %2052 = vrcp.f32 %v1379_v38  ;;  %v1392_v28 = vrot.slane %v1391_v19, 1  ;;  %v1517_v32 = vadd.f32 %v1516_v12, %v1515_v60 }
 0x167   : > { %v1469_v56 = vrot.slane %v1468_v34, 2  ;;  %v2706_v18 = vpop.eup %2046  ;;  %v1456_v29 = vmul.f32 %v2072_v5, %v2039_v44  ;;  %v1462_v27 = vrot.slane %v1461_v30, 2  ;;  %v1437_v14 = vrot.slane %v1436_v17, 4 }
 0x168   : > { %2054 = vrcp.f32 %v1337_v26  ;;  %v1413_v16 = vrot.slane %v1412_v21, 1  ;;  %v1537_v15 = vrot.slane %v1536_v58, 4  ;;  %v1405_v46 = vadd.f32 %v1404_v62, %v1403_v10  ;;  %v2074_v62 = vld [vmem:[%s2325_s10 + $0x78] sm:$0xff] }
 0x169   : > { %v1418_v39 = vrot.slane %v1417_v7, 2  ;;  %v1400_v59 = vadd.f32 %v1399_v57, %v2674_v40  ;;  %v1531_v48 = vadd.f32 %v1530_v13, %v1529_v20  ;;  %v1425_v51 = vrot.slane %v1424_v11, 2 }
 0x16a   : > { %v1512_v38 = vadd.f32 %v1511_v0, %v2653_v63  ;;  %v2716_v44 = vadd.f32 %v1525_v4, %v2666_v25  ;;  %v1393_v60 = vadd.f32 %v1392_v28, %v1391_v19  ;;  %v1518_v37 = vrot.slane %v1517_v32, 2  ;;  %v2075_v28 = vld [vmem:[%s2325_s10 + $0x70] sm:$0xff] }
 0x16b   : > { %v1470_v61 = vadd.f32 %v1469_v56, %v1468_v34  ;;  %v1550_v6 = vsel %vm459_vm2, %v1456_v29, 0.0  ;;  %v1455_v36 = vmul.f32 %v2073_v24, %v2679_v47  ;;  %v1463_v40 = vadd.f32 %v1462_v27, %v1461_v30 }
 0x16c   : > { %v1438_v1 = vadd.f32 %v1437_v14, %v1436_v17  ;;  %v1414_v53 = vadd.f32 %v1413_v16, %v1412_v21  ;;  %v2721_v42 = vadd.f32 %v1537_v15, %v1536_v58  ;;  %v1406_v54 = vrot.slane %v1405_v46, 1 }
 0x16d   : > { %v1419_v63 = vadd.f32 %v1418_v39, %v1417_v7  ;;  %2056 = vrcp.f32 %v1400_v59  ;;  %v1532_v0 = vrot.slane %v1531_v48, 2  ;;  %v1426_v10 = vadd.f32 %v1425_v51, %v1424_v11 }
 0x16e   : > { %v1513_v25 = vrot.slane %v1512_v38, 1  ;;  %v2723_v4 = vadd.f32 %v1518_v37, %v1517_v32  ;;  %v1551_v43 = vrot.slane %v1550_v6, 4  ;;  %v1471_v2 = vrot.slane %v1470_v61, 1 }
 0x16f   : > { %v1507_v49 = vadd.f32 %v1506_v45, %v2662_v41  ;;  %2058 = vrcp.f32 %v1393_v60  ;;  %v1543_v47 = vsel %vm459_vm2, %v1455_v36, 0.0  ;;  %v1464_v57 = vrot.slane %v1463_v40, 1 }
 0x170   : > { %v1439_v12 = vrot.slane %v1438_v1, 2  ;;  %v1539_v3 = vrot.slane %v2721_v42, 2  ;;  %2060 = vrcp.f32 %v1414_v53  ;;  %v1407_v31 = vadd.f32 %v1406_v54, %v1405_v46 }
 0x171   : > { %v1420_v19 = vrot.slane %v1419_v63, 1  ;;  %v2049_v20 = vpop.eup %2048  ;;  %v2730_v34 = vadd.f32 %v1532_v0, %v1531_v48  ;;  %v1427_v22 = vrot.slane %v1426_v10, 1  ;;  %v1514_v21 = vadd.f32 %v1513_v25, %v1512_v38 }
 0x172   : > { %v1591_v41 = vmul.f32 %v2698_v9, %v2660_v52  ;;  %v2051_v45 = vpop.eup %2050  ;;  %v2734_v58 = vadd.f32 %v1551_v43, %v1550_v6  ;;  %v1472_v55 = vadd.f32 %v1471_v2, %v1470_v61  ;;  %v1544_v30 = vrot.slane %v1543_v47, 4 }
 0x173   : > { %v1458_v7 = vmul.f32 %v2074_v62, %v2701_v33  ;;  %v2053_v17 = vpop.eup %2052  ;;  %v1465_v13 = vadd.f32 %v1464_v57, %v1463_v40  ;;  %v1440_v11 = vadd.f32 %v1439_v12, %v1438_v1  ;;  %v1429_v26 = vsel %vm459_vm2, %v2051_v45, 0.0 }
 0x174   : > { %v1457_v32 = vmul.f32 %v2075_v28, %v2051_v45  ;;  %2062 = vrcp.f32 %v1407_v31  ;;  %v1421_v5 = vadd.f32 %v1420_v19, %v1419_v63  ;;  %v1430_v52 = vrot.slane %v1429_v26, 4 }
 0x175   : > { %v2055_v56 = vpop.eup %2054  ;;  %v1592_v9 = vmul.f32 %v2687_v50, %v2658_v23  ;;  %v1428_v29 = vadd.f32 %v1427_v22, %v1426_v10  ;;  %v1588_v27 = vmul.f32 %v2049_v20, %v1472_v55  ;;  %v1545_v16 = vadd.f32 %v1544_v30, %v1543_v47 }
 0x176   : > { %v1587_v14 = vmul.f32 %v2055_v56, %v1465_v13  ;;  %v1557_v33 = vsel %vm459_vm2, %v1457_v32, 0.0  ;;  %v1564_v15 = vsel %vm459_vm2, %v1458_v7, 0.0  ;;  %v1431_v46 = vadd.f32 %v1430_v52, %v1429_v26 }
 0x177   : > { %vm1619_vm4 = vcmask 1041409   ;;  %v1441_v39 = vrot.slane %v1440_v11, 1  ;;  %vm1621_vm5 = vcmask 1042434   ;;  %vm1623_vm6 = vcmask 1043459  }
 0x178   : > { %v1620_v59 = vsel %vm1619_vm4, %v1588_v27, %v1587_v14  ;;  %2064 = vrcp.f32 %v1421_v5  ;;  %v1432_v48 = vrot.slane %v1431_v46, 2  ;;  %v1558_v23 = vrot.slane %v1557_v33, 4 }
 0x179   : > { %v1622_v50 = vsel %vm1621_vm5, %v2670_v8, %v1620_v59  ;;  %v1565_v51 = vrot.slane %v1564_v15, 4  ;;  %v1593_v38 = vmul.f32 %v2053_v17, %v1507_v49  ;;  %vm1625_vm7 = vcmask 1044484  }
 0x17a   : > { %v1624_v60 = vsel %vm1623_vm6, %v2681_v35, %v1622_v50  ;;  %v2057_v37 = vpop.eup %2056  ;;  %v1546_v61 = vrot.slane %v1545_v16, 2  ;;  %v1433_v6 = vadd.f32 %v1432_v48, %v1431_v46  ;;  %vm1627_vm8 = vcmask 1045509  }
 0x17b   : > { %v1626_v24 = vsel %vm1625_vm7, %v1591_v41, %v1624_v60  ;;  %v1442_v36 = vadd.f32 %v1441_v39, %v1440_v11  ;;  %v1594_v40 = vmul.f32 %v2706_v18, %v1514_v21  ;;  %vm1629_vm9 = vcmask 1046534  }
 0x17c   : > { %v1628_v1 = vsel %vm1627_vm8, %v1592_v9, %v1626_v24  ;;  %v2059_v8 = vpop.eup %2058  ;;  %v1434_v53 = vrot.slane %v1433_v6, 1  ;;  %v1559_v54 = vadd.f32 %v1558_v23, %v1557_v33  ;;  %vm1631_vm10 = vcmask 1047559  }
 0x17d   : > { %v1630_v35 = vsel %vm1629_vm9, %v1593_v38, %v1628_v1  ;;  %v2061_v63 = vpop.eup %2060  ;;  %v1520_v0 = vrot.slane %v2723_v4, 1  ;;  %2066 = vrcp.f32 %v1428_v29  ;;  %v1566_v10 = vadd.f32 %v1565_v51, %v1564_v15 }
 0x17e   : > { %v1632_v25 = vsel %vm1631_vm10, %v1594_v40, %v1630_v35  ;;  %v1534_v43 = vrot.slane %v2730_v34, 1  ;;  %v1547_v2 = vadd.f32 %v1546_v61, %v1545_v16  ;;  %v1435_v18 = vadd.f32 %v1434_v53, %v1433_v6 }
 0x17f   : > { %1642 = vst.msk [vmem:[%s2759_s11] sm:$0xff] %vm459_vm2, %v1632_v25  ;;  %v1527_v49 = vrot.slane %v2716_v44, 1  ;;  %v1540_v47 = vadd.f32 %v1539_v3, %v2721_v42  ;;  %v1553_v57 = vrot.slane %v2734_v58, 2  ;;  %2068 = vrcp.f32 %v1442_v36 }
 0x180   : > { %v1560_v12 = vrot.slane %v1559_v54, 2  ;;  %2070 = vrcp.f32 %v1435_v18  ;;  %v1521_v19 = vadd.f32 %v1520_v0, %v2723_v4  ;;  %v1567_v20 = vrot.slane %v1566_v10, 2 }
 0x181   : > { %v2063_v31 = vpop.eup %2062  ;;  %v1535_v22 = vadd.f32 %v1534_v43, %v2730_v34  ;;  %v1548_v21 = vrot.slane %v1547_v2, 1  ;;  %v1528_v41 = vadd.f32 %v1527_v49, %v2716_v44  ;;  %v1541_v55 = vrot.slane %v1540_v47, 1 }
 0x182   : > { %v1595_v45 = vmul.f32 %v2059_v8, %v1521_v19  ;;  %v1554_v30 = vadd.f32 %v1553_v57, %v2734_v58  ;;  %v1561_v42 = vadd.f32 %v1560_v12, %v1559_v54  ;;  %v1568_v17 = vadd.f32 %v1567_v20, %v1566_v10 }
 0x183   : > { %v1597_v62 = vmul.f32 %v2063_v31, %v1535_v22  ;;  %v1596_v7 = vmul.f32 %v2057_v37, %v1528_v41  ;;  %v1549_v13 = vadd.f32 %v1548_v21, %v1547_v2  ;;  %v1542_v11 = vadd.f32 %v1541_v55, %v1540_v47 }
 0x184   : > { %v1555_v4 = vrot.slane %v1554_v30, 1  ;;  %v1562_v34 = vrot.slane %v1561_v42, 1  ;;  %v1569_v56 = vrot.slane %v1568_v17, 1 }
 0x185   : > { %v2065_v3 = vpop.eup %2064  ;;  %v1633_v26 = vsel %vm1619_vm4, %v1596_v7, %v1595_v45  ;;  %v1598_v32 = vmul.f32 %v2061_v63, %v1542_v11 }
 0x186   : > { %v1599_v28 = vmul.f32 %v2065_v3, %v1549_v13  ;;  %v1634_v44 = vsel %vm1621_vm5, %v1597_v62, %v1633_v26  ;;  %v1556_v58 = vadd.f32 %v1555_v4, %v1554_v30  ;;  %v1563_v29 = vadd.f32 %v1562_v34, %v1561_v42 }
 0x187   : > { %v1635_v52 = vsel %vm1623_vm6, %v1598_v32, %v1634_v44  ;;  %v1570_v33 = vadd.f32 %v1569_v56, %v1568_v17 }
 0x188   : > { %v1636_v27 = vsel %vm1625_vm7, %v1599_v28, %v1635_v52 }
 0x18a   : > { %v2067_v5 = vpop.eup %2066 }
 0x18b   : > { %v1600_v16 = vmul.f32 %v2067_v5, %v1556_v58 }
 0x18c   : > { %v2069_v9 = vpop.eup %2068 }
 0x18d   : > { %v2071_v14 = vpop.eup %2070  ;;  %v1602_v46 = vmul.f32 %v2069_v9, %v1570_v33  ;;  %v1637_v39 = vsel %vm1627_vm8, %v1600_v16, %v1636_v27 }
 0x18e   : > { %v1601_v15 = vmul.f32 %v2071_v14, %v1563_v29 }
 0x190   : > { %v1638_v59 = vsel %vm1629_vm9, %v1601_v15, %v1637_v39 }
 0x191   : > { %v1639_v48 = vsel %vm1631_vm10, %v1602_v46, %v1638_v59 }
 0x192   : > { %1643 = vst.msk [vmem:[%s2759_s11 + $0x8] sm:$0xff] %vm459_vm2, %v1639_v48 }
 0x193   : > { %2115 = shalt.err (!%p2112_p1)
}
 0x194   : > { %s2116_s17 = scalar_lea.hbm %s2782_s18, 256  ;;  %s2120_s16 = scalar_lea.hbm %s2838_s6, 512 }
 0x195   : > { %p2117_p2 = scmp.ne.s32.totalorder %s2782_s18, %s2116_s17  ;;  %p2121_p7 = scmp.lt.s32.totalorder %s2782_s18, %s2838_s6 }
 0x196   : > { %p2122_p8 = scmp.lt.s32.totalorder %s2120_s16, %s2116_s17 }
 0x197   : > { %p2118_p3 = pnand %p2117_p2, %p2246_p5 }
 0x198   : > { %p2123_p6 = por %p2122_p8, %p2121_p7 }
 0x199   : > { %p2119_p4 = pneg %p2118_p3 }
 0x19b   : > { %p2124_p9 = pnand %p2123_p6, %p2119_p4 }
 0x19d   : > { %2127 = shalt.err (!%p2124_p9)
}
 0x19e   : > { %s2171_s12 = smov 128   ;;  %s2172_s14 = smov 8  }
 0x19f   : > { %1959 = dma.vmem_to_hbm [thread:$0]  (%p2246_p5), %s2784_s13, 256, %s2782_s18, %s2792_s25, %s2171_s12, %s2171_s12, %s2172_s14  }
 0x1a0 PF: > { %p1971_p10 = scmp.ge.s32.totalorder %s2166_s24, 2  ;;  %s1673_s15 = sand.u32 1, %s2154_s21  }
 0x1a1   : > { %p2842_p11 = scmp.ne.s32.totalorder %s2840_s8, 0  ;;  %s1674_s19 = scalar_lea.sflag [#allocation4], %s1673_s15 }
 0x1a3   : > { %p1966_p12 = pnand %p1971_p10, %p2842_p11 }
 0x1a5   : > { %p1967_p13 = pneg %p1966_p12 }
 0x1a7   : > { %2149 = dma.done.wait (%p1967_p13), %s1674_s19, 256  }
 0x1a8   : > { %2151 = vsyncadd (%p1967_p13), %s1674_s19, 4294967040  ;;  %p17_p0 = scmp.ge.s32.totalorder %s2233_s27, 4   ;;  %s2843_s21 = smov %s2158_s22 }
 0x1a9   : > { %s2844_s22 = smov %s2162_s23  ;;  %s2845_s23 = smov %s2244_s30 }
 0x1aa   : > { %s2846_s24 = smov %s2233_s27  ;;  %19 = sbr.rel (!%p17_p0) target bundleno = 4 (0x4), region = 93 }
 0x1af   :  { %1679 = vsyncpa [#allocation3], 1 }
 0x1b0   :  { %1681 = vsyncpa [#allocation3 + $0x1], 1 }
 0x1b1   :  { %1682 = vsyncpa [#allocation4], 1 }
 0x1b2   :  { %1684 = vsyncpa [#allocation4 + $0x1], 1 }

</bundles_post_ra>
